<compile_context>
chip_gen: v5e
topology: v5e:2x2
jax: 0.10.0
libtpu: 0.0.40
codegen_flags: <defaults>
</compile_context>

<pallas_src>
import functools

import jax
import jax.numpy as jnp
from jax.experimental import pallas as pl
from jax.experimental.pallas import tpu as pltpu


def _layernorm_kernel(x_ref, w_ref, b_ref, o_ref, *, eps, n_elem):
    # x_ref, o_ref: (TM, H*W) VMEM tiles; w_ref, b_ref: (TM, 1) per-row affine params.
    x = x_ref[...].astype(jnp.float32)

    inv_n = 1.0 / n_elem
    # NOTE: unbiased variance (÷ (H*W-1)) to match torch.var_mean defaults.
    # H*W == 1 is ill-defined in the reference (NaN); denominator is clamped here.
    inv_nm1 = 1.0 / max(n_elem - 1, 1)

    # One traversal: sum and sum-of-squares, reduced along the lane-dense axis.
    s = jnp.sum(x, axis=-1, keepdims=True)            # (TM, 1)
    ss = jnp.sum(x * x, axis=-1, keepdims=True)       # (TM, 1)
    mean = s * inv_n
    var = (ss - n_elem * mean * mean) * inv_nm1       # unbiased variance

    inv = 1.0 / (var + eps)                           # tiny (TM, 1) op
    w = w_ref[...].astype(jnp.float32)                # (TM, 1)
    b = b_ref[...].astype(jnp.float32)                # (TM, 1)
    scale = w * inv
    shift = b - mean * scale

    # Single FMA output pass: out = x*scale + shift == w*(x-mean)/(var+eps) + b
    o_ref[...] = (x * scale + shift).astype(o_ref.dtype)


def layer_norm(x, weight, bias, eps=0.001):
    """x: (N, C, H, W); weight, bias: (C,). Returns (N, C, H, W). Eval-mode only."""
    N, C, H, W = x.shape
    rows = N * C
    hw = H * W

    # Lane-dense layout: (N*C, H*W). Row r corresponds to (n, c) = (r // C, r % C).
    x2 = x.reshape(rows, hw)
    w_rows = jnp.tile(weight.astype(jnp.float32), N).reshape(rows, 1)
    b_rows = jnp.tile(bias.astype(jnp.float32), N).reshape(rows, 1)

    # Row-tile size: amortize the ~0.35 us per-step overhead while keeping the
    # double-buffered f32 input + output (~4 * TM * HW * 4 bytes) well under the
    # scoped VMEM limit on every generation (v7x has only 64 MiB physical).
    bytes_per_row = hw * 4 * 4
    tm = max(8, min(512, (8 * 1024 * 1024) // max(bytes_per_row, 1)))
    tm = max(8, (tm // 8) * 8)
    if rows <= tm:
        tm = ((rows + 7) // 8) * 8  # single row-block, padded to sublane multiple

    padded_rows = ((rows + tm - 1) // tm) * tm
    if padded_rows != rows:
        pad = padded_rows - rows
        x2 = jnp.pad(x2, ((0, pad), (0, 0)))          # zero rows -> finite, discarded output
        w_rows = jnp.pad(w_rows, ((0, pad), (0, 0)))
        b_rows = jnp.pad(b_rows, ((0, pad), (0, 0)))

    kernel = functools.partial(_layernorm_kernel, eps=eps, n_elem=hw)

    out2 = pl.pallas_call(
        kernel,
        out_shape=jax.ShapeDtypeStruct((padded_rows, hw), x.dtype),
        grid=(padded_rows // tm,),
        in_specs=[
            pl.BlockSpec((tm, hw), lambda i: (i, 0)),   # x rows (lane-dense)
            pl.BlockSpec((tm, 1), lambda i: (i, 0)),    # per-row weight
            pl.BlockSpec((tm, 1), lambda i: (i, 0)),    # per-row bias
        ],
        out_specs=pl.BlockSpec((tm, hw), lambda i: (i, 0)),
        compiler_params=pltpu.CompilerParams(
            dimension_semantics=("parallel",),          # megacore / 2-TC row split
            vmem_limit_bytes=64 * 1024 * 1024,
        ),
    )(x2, w_rows, b_rows)

    return out2[:rows].reshape(N, C, H, W)


if __name__ == "__main__":
    key = jax.random.PRNGKey(0)
    N, C, H, W = 2, 4, 16, 16
    x = jax.random.normal(key, (N, C, H, W), dtype=jnp.float32)

    # reset_parameters(): weight = ones, bias = zeros
    weight = jnp.ones((C,), dtype=jnp.float32)
    bias = jnp.zeros((C,), dtype=jnp.float32)

    out = layer_norm(x, weight, bias, eps=0.001)
    out = jax.block_until_ready(out)

    # sanity check against a pure-JAX reference of the same math
    mean = jnp.mean(x, axis=(2, 3), keepdims=True)
    var = jnp.sum((x - mean) ** 2, axis=(2, 3), keepdims=True) / (H * W - 1)
    ref = (x - mean) / (var + 0.001)
    ref = weight.reshape(1, -1, 1, 1) * ref + bias.reshape(1, -1, 1, 1)
    assert jnp.allclose(out, ref, atol=1e-4, rtol=1e-4)

    print("KERNEL_OK")
</pallas_src>

<mosaic_0001>
module attributes {stable_mosaic.version = 11 : i64} {
  func.func @_layernorm_kernel(%arg0: i32, %arg1: memref<8x256xf32, #tpu.memory_space<vmem>>, %arg2: memref<8x1xf32, #tpu.memory_space<vmem>>, %arg3: memref<8x1xf32, #tpu.memory_space<vmem>>, %arg4: memref<8x256xf32, #tpu.memory_space<vmem>>) attributes {dimension_semantics = [#tpu.dimension_semantics<parallel>], iteration_bounds = array<i64: 1>, scalar_prefetch = 0 : i64, scratch_operands = 0 : i64, tpu.core_type = #tpu.core_type<tc>, window_params = [{transform_indices = @transform_0, window_bounds = array<i64: 8, 256>}, {transform_indices = @transform_1, window_bounds = array<i64: 8, 1>}, {transform_indices = @transform_2, window_bounds = array<i64: 8, 1>}, {transform_indices = @transform_3, window_bounds = array<i64: 8, 256>}]} {
    %c0 = arith.constant 0 : index
    %c0_0 = arith.constant 0 : index
    %0 = vector.load %arg1[%c0, %c0_0] : memref<8x256xf32, #tpu.memory_space<vmem>>, vector<8x256xf32>
    %cst = arith.constant dense<0.000000e+00> : vector<8xf32>
    %1 = vector.multi_reduction <add>, %0, %cst [1] : vector<8x256xf32> to vector<8xf32>
    %2 = vector.shape_cast %1 : vector<8xf32> to vector<8x1xf32>
    %3 = arith.mulf %0, %0 : vector<8x256xf32>
    %cst_1 = arith.constant dense<0.000000e+00> : vector<8xf32>
    %4 = vector.multi_reduction <add>, %3, %cst_1 [1] : vector<8x256xf32> to vector<8xf32>
    %5 = vector.shape_cast %4 : vector<8xf32> to vector<8x1xf32>
    %cst_2 = arith.constant 3.906250e-03 : f32
    %6 = vector.broadcast %cst_2 : f32 to vector<8x1xf32>
    %7 = arith.mulf %2, %6 : vector<8x1xf32>
    %cst_3 = arith.constant 2.560000e+02 : f32
    %8 = vector.broadcast %cst_3 : f32 to vector<8x1xf32>
    %9 = arith.mulf %8, %7 : vector<8x1xf32>
    %10 = arith.mulf %9, %7 : vector<8x1xf32>
    %11 = arith.subf %5, %10 : vector<8x1xf32>
    %cst_4 = arith.constant 0.00392156886 : f32
    %12 = vector.broadcast %cst_4 : f32 to vector<8x1xf32>
    %13 = arith.mulf %11, %12 : vector<8x1xf32>
    %cst_5 = arith.constant 1.000000e-03 : f32
    %14 = vector.broadcast %cst_5 : f32 to vector<8x1xf32>
    %15 = arith.addf %13, %14 : vector<8x1xf32>
    %cst_6 = arith.constant 1.000000e+00 : f32
    %16 = vector.broadcast %cst_6 : f32 to vector<8x1xf32>
    %17 = arith.divf %16, %15 : vector<8x1xf32>
    %c0_7 = arith.constant 0 : index
    %c0_8 = arith.constant 0 : index
    %18 = vector.load %arg2[%c0_7, %c0_8] : memref<8x1xf32, #tpu.memory_space<vmem>>, vector<8x1xf32>
    %c0_9 = arith.constant 0 : index
    %c0_10 = arith.constant 0 : index
    %19 = vector.load %arg3[%c0_9, %c0_10] : memref<8x1xf32, #tpu.memory_space<vmem>>, vector<8x1xf32>
    %20 = arith.mulf %18, %17 : vector<8x1xf32>
    %21 = arith.mulf %7, %20 : vector<8x1xf32>
    %22 = arith.subf %19, %21 : vector<8x1xf32>
    %23 = vector.broadcast %20 : vector<8x1xf32> to vector<8x256xf32>
    %24 = arith.mulf %0, %23 : vector<8x256xf32>
    %25 = vector.broadcast %22 : vector<8x1xf32> to vector<8x256xf32>
    %26 = arith.addf %24, %25 : vector<8x256xf32>
    %c0_11 = arith.constant 0 : index
    %c0_12 = arith.constant 0 : index
    %27 = vector.load %arg4[%c0_11, %c0_12] : memref<8x256xf32, #tpu.memory_space<vmem>>, vector<8x256xf32>
    tpu.vector_store %arg4[%c0_11, %c0_12], %26 {strides = array<i32>} : memref<8x256xf32, #tpu.memory_space<vmem>>, vector<8x256xf32>,
    return
  }
  func.func @transform_0(%arg0: i32) -> (i32, i32) {
    %c0_i32 = arith.constant 0 : i32
    %c0_i32_0 = arith.constant 0 : i32
    return %arg0, %c0_i32 : i32, i32
  }
  func.func @transform_1(%arg0: i32) -> (i32, i32) {
    %c0_i32 = arith.constant 0 : i32
    %c0_i32_0 = arith.constant 0 : i32
    return %arg0, %c0_i32 : i32, i32
  }
  func.func @transform_2(%arg0: i32) -> (i32, i32) {
    %c0_i32 = arith.constant 0 : i32
    %c0_i32_0 = arith.constant 0 : i32
    return %arg0, %c0_i32 : i32, i32
  }
  func.func @transform_3(%arg0: i32) -> (i32, i32) {
    %c0_i32 = arith.constant 0 : i32
    %c0_i32_0 = arith.constant 0 : i32
    return %arg0, %c0_i32 : i32, i32
  }
}

</mosaic_0001>

<bundles_post_ra>
// kernel: tpu_custom_call.1
= control target key start
LH: loop header
LB: loop body
LE: loop exit
PB: predicated region body
PF: predicated region fallthrough
CT: control target
= control target key end

     0   :  { %s152_s0 = inlined_call_operand.vmem [shape: f32[8,256], index: 0, kind: input, shape index: {}]   ;;  %s153_s1 = inlined_call_operand.vmem [shape: f32[8,1], index: 1, kind: input, shape index: {}]   ;;  %s154_s2 = inlined_call_operand.vmem [shape: f32[8,1], index: 2, kind: input, shape index: {}]   ;;  %s155_s3 = inlined_call_operand.hbm [shape: f32[8,256], index: 3, kind: output, shape index: {}]  }
   0x1   :  { %v15_v0 = vld [vmem:[%s152_s0] sm:$0xff]  ;;  %v16_v1 = vld [vmem:[%s152_s0 + $0x8] sm:$0xff] }
   0x2   :  { %8 = vsyncpa [#allocation3], 0  ;;  %v17_v2 = vadd.f32 %v16_v1, %v15_v0  ;;  %v20_v3 = vmul.f32 %v15_v0, %v15_v0  ;;  %v21_v4 = vmul.f32 %v16_v1, %v16_v1  ;;  %v115_v6 = vmov 0   ;;  %v46_v23 = vld [vmem:[%s153_s1] sm:$0xff]  ;;  %s116_s19 = smov [#allocation2]   ;;  %s74_s1 = sshll.u32 %s155_s3, 4  ;;  %s75_s1 = int_to_ptr.hbm [resolvable:$true] %s74_s1 }
   0x3   :  { %85 = vset.pattern.permute.xlu1 %v115_v6  ;;  %86 = vset.pattern.permute.xlu0 %v115_v6  ;;  %v47_v28 = vld [vmem:[%s154_s2] sm:$0xff]  ;;  %s72_s20 = sshll.u32 %s116_s19, 4  ;;  %s73_s20 = int_to_ptr.vmem [resolvable:$true] %s72_s20 }
   0x4   :  { %18 = vadd.xlane.f32.xlu0 %v17_v2  ;;  %v22_v5 = vadd.f32 %v21_v4, %v20_v3 }
   0xc   :  { %23 = vadd.xlane.f32.xlu0 %v22_v5 }
  0x77   :  { %v19_v7 = vpop.xlane.xlu0 %18 }
  0x78   :  { %v25_v8 = vmul.f32 0.00390625, %v19_v7 }
  0x7a   :  { %v26_v9 = vmul.f32 256.0, %v25_v8 }
  0x7c   :  { %v27_v10 = vmul.f32 %v26_v9, %v25_v8 }
  0x7f   :  { %v24_v11 = vpop.xlane.xlu0 %23 }
  0x80   :  { %v28_v12 = vsub.f32 %v24_v11, %v27_v10 }
  0x82   :  { %v29_v13 = vmul.f32 0.003921569, %v28_v12 }
  0x84   :  { %v30_v14 = vadd.f32 0.001, %v29_v13 }
  0x86   :  { %87 = vrcp.f32 %v30_v14  ;;  %v42_v18 = vand.u32 2147483648, %v30_v14  ;;  %v40_v20 = vand.u32 2147483647, %v30_v14  ;;  %vm36_vm1 = vweird.f32 %v30_v14 }
  0x88   :  { %v43_v22 = vor.u32 1.1754944e-38, %v42_v18  ;;  %vm41_vm3 = vcmp.eq.f32.partialorder %v40_v20, 8.507059e+37 }
  0x8c   :  { %v88_v15 = vpop.eup %87 }
  0x8d   :  { %v32_v16 = vmul.f32 %v88_v15, %v30_v14  ;;  %vm37_vm0 = vweird.f32 %v88_v15 }
  0x8e   :  { %vm38_vm2 = vmor %vm36_vm1, %vm37_vm0 }
  0x8f   :  { %v33_v17 = vsub.f32 1.0, %v32_v16 }
  0x91   :  { %v34_v19 = vmul.f32 %v88_v15, %v33_v17 }
  0x93   :  { %v35_v21 = vadd.f32 %v88_v15, %v34_v19 }
  0x95   :  { %v39_v24 = vsel %vm38_vm2, %v88_v15, %v35_v21 }
  0x96   :  { %v44_v25 = vsel %vm41_vm3, %v43_v22, %v39_v24 }
  0x97   :  { %v48_v26 = vmul.f32 %v46_v23, %v44_v25 }
  0x99   :  { %53 = vperm.xlu1 %85, %v48_v26   ;;  %v49_v27 = vmul.f32 %v48_v26, %v25_v8 }
  0x9b   :  { %v50_v29 = vsub.f32 %v47_v28, %v49_v27 }
  0xa1   :  { %60 = vperm.xlu1 %85, %v50_v29  }
 0x10b   :  { %v54_v30 = vpop.permute.xlu1 %53 }
 0x10c   :  { %v56_v31 = vmul.f32 %v54_v30, %v15_v0  ;;  %v57_v32 = vmul.f32 %v54_v30, %v16_v1 }
 0x113   :  { %v61_v33 = vpop.permute.xlu1 %60 }
 0x114   :  { %v63_v34 = vadd.f32 %v61_v33, %v56_v31  ;;  %v64_v35 = vadd.f32 %v61_v33, %v57_v32 }
 0x116   :  { %65 = vst [vmem:[#allocation2] sm:$0xff] %v63_v34 }
 0x117   :  { %66 = vst [vmem:[#allocation2 + $0x8] sm:$0xff] %v64_v35 }
 0x118   :  { %77 = dma.vmem_to_hbm [thread:$0]  %s73_s20, 256, %s75_s1, [#allocation3]  }
 0x119   :  { %113 = dma.done.wait [#allocation3], 256  }
 0x11a   :  { %114 = vsyncadd [#allocation3], 4294967040 }
 0x11b   :  { %82 = vsyncpa [#allocation3], 1 }

</bundles_post_ra>
